<compile_context>
chip_gen: v5e
topology: v5e:2x2
jax: 0.10.0
libtpu: 0.0.40
codegen_flags: <defaults>
</compile_context>

<pallas_src>
import jax
import jax.numpy as jnp
from jax import lax
from jax.experimental import pallas as pl
from jax.experimental.pallas import tpu as pltpu

_NEG_SLOPE = 0.01  # nn.LeakyReLU() default negative_slope


def _round_up(n, m):
    return ((n + m - 1) // m) * m


def _leaky_relu(x):
    return jnp.where(x >= 0, x, _NEG_SLOPE * x)


def mlp_kernel(x_ref,
               w1_ref, b1_ref,
               w2_ref, b2_ref,
               w3_ref, b3_ref,
               w4_ref, b4_ref,
               o_ref):
    # x_ref: (TB, 28) f32, natural layout. Cast to bf16 on-chip and contract
    # over the feature dim so activations live as (features, TB): batch on
    # lanes, features on sublanes.
    xb = x_ref[...].astype(jnp.bfloat16)

    # lin1 + sigmoid   (dropout = identity in eval mode)
    # (128, 28) x (TB, 28) contracting dim1<->dim1 -> (128, TB), f32 acc.
    h = lax.dot_general(w1_ref[...], xb, (((1,), (1,)), ((), ())),
                        preferred_element_type=jnp.float32) + b1_ref[...]
    # exp and reciprocal both go to the EUP slot; math in f32, store bf16.
    h = (pl.reciprocal(1.0 + jnp.exp(-h), approx=True)).astype(jnp.bfloat16)

    # lin3 + LeakyReLU
    h = jnp.dot(w2_ref[...], h, preferred_element_type=jnp.float32) + b2_ref[...]
    h = _leaky_relu(h).astype(jnp.bfloat16)

    # lin4 + LeakyReLU
    h = jnp.dot(w3_ref[...], h, preferred_element_type=jnp.float32) + b3_ref[...]
    h = _leaky_relu(h).astype(jnp.bfloat16)

    # lin5 (final projection to 1): (1,32)@(32,TB) -> (1,TB), lane-dense store.
    out = jnp.dot(w4_ref[...], h, preferred_element_type=jnp.float32) + b4_ref[0, 0]
    o_ref[...] = out.astype(o_ref.dtype)


def mlp_forward(x, params, *, tb_max=4096):
    """x: (B, 28) float32.
    params: PyTorch-layout weights w_i (out, in) and biases b_i (out,)."""
    B, d_in = x.shape
    assert d_in == 28

    # Batch tile (lane dimension of the in-kernel activations).
    if B <= 128:
        tb = B                                   # single full-array block
    else:
        tb = min(tb_max, _round_up(B, 128))
        if pl.cdiv(B, tb) < 2:
            # Ensure >= 2 grid steps so v7x's two TensorCores both get work.
            tb = _round_up(pl.cdiv(B, 2), 128)
    grid = (pl.cdiv(B, tb),)

    w1 = params["w1"].astype(jnp.bfloat16)                 # (128, 28)
    w2 = params["w2"].astype(jnp.bfloat16)                 # (64, 128)
    w3 = params["w3"].astype(jnp.bfloat16)                 # (32, 64)
    w4 = params["w4"].astype(jnp.bfloat16)                 # (1, 32)
    b1 = params["b1"].reshape(-1, 1).astype(jnp.float32)   # (128, 1)
    b2 = params["b2"].reshape(-1, 1).astype(jnp.float32)   # (64, 1)
    b3 = params["b3"].reshape(-1, 1).astype(jnp.float32)   # (32, 1)
    b4 = params["b4"].reshape(1, 1).astype(jnp.float32)    # (1, 1) -> SMEM

    def resident(a):  # full array, VMEM-resident across all grid steps
        return pl.BlockSpec(a.shape, lambda i: (0,) * a.ndim)

    flops = 2 * (28 * 128 + 128 * 64 + 64 * 32 + 32 * 1) * B
    bytes_accessed = (B * (28 * 4 + 4)                       # x f32 in, out f32
                      + (28 * 128 + 128 * 64 + 64 * 32 + 32) * 2  # bf16 weights
                      + (128 + 64 + 32 + 1) * 4)             # f32 biases
    transcendentals = 2 * 128 * B                            # exp + recip (lin1)

    out_t = pl.pallas_call(
        mlp_kernel,
        out_shape=jax.ShapeDtypeStruct((1, B), jnp.float32),
        grid=grid,
        in_specs=[
            pl.BlockSpec((tb, 28), lambda i: (i, 0)),             # streamed x
            resident(w1), resident(b1),
            resident(w2), resident(b2),
            resident(w3), resident(b3),
            resident(w4),
            pl.BlockSpec(memory_space=pltpu.MemorySpace.SMEM),    # b4 scalar
        ],
        out_specs=pl.BlockSpec((1, tb), lambda i: (0, i)),        # lane-dense
        compiler_params=pltpu.CompilerParams(
            dimension_semantics=("parallel",),   # megacore on v7x
            vmem_limit_bytes=32 * 1024 * 1024,   # safe on v5e/v6e/v7x
        ),
        cost_estimate=pl.CostEstimate(
            flops=flops,
            bytes_accessed=bytes_accessed,
            transcendentals=transcendentals),
    )(x.astype(jnp.float32), w1, b1, w2, b2, w3, b3, w4, b4)

    return out_t[0, :].reshape(B, 1).astype(x.dtype)


def init_params(key):
    """PyTorch default nn.Linear init: U(-1/sqrt(fan_in), +1/sqrt(fan_in)).
    Weights stored (out_features, in_features), biases (out_features,)."""
    dims = [(28, 128), (128, 64), (64, 32), (32, 1)]
    params = {}
    keys = jax.random.split(key, 2 * len(dims))
    for i, (fan_in, fan_out) in enumerate(dims):
        bound = 1.0 / float(fan_in) ** 0.5
        params[f"w{i + 1}"] = jax.random.uniform(
            keys[2 * i], (fan_out, fan_in),
            minval=-bound, maxval=bound, dtype=jnp.float32)
        params[f"b{i + 1}"] = jax.random.uniform(
            keys[2 * i + 1], (fan_out,),
            minval=-bound, maxval=bound, dtype=jnp.float32)
    return params


def _mm(a, b):
    return jnp.dot(a, b, precision=lax.Precision.HIGHEST)


def reference_forward(x, params):
    """Pure-JAX reference matching the kernel's numerics (bf16 operands into
    each matmul, f32 accumulation / bias / activation math)."""
    r = lambda a: a.astype(jnp.bfloat16).astype(jnp.float32)
    h = jax.nn.sigmoid(_mm(r(x), r(params["w1"]).T) + params["b1"])
    h = jax.nn.leaky_relu(_mm(r(h), r(params["w2"]).T) + params["b2"], _NEG_SLOPE)
    h = jax.nn.leaky_relu(_mm(r(h), r(params["w3"]).T) + params["b3"], _NEG_SLOPE)
    return _mm(r(h), r(params["w4"]).T) + params["b4"]


if __name__ == "__main__":
    key = jax.random.PRNGKey(0)
    pkey, xkey = jax.random.split(key)
    params = init_params(pkey)

    B = 8
    x = jax.random.normal(xkey, (B, 28), dtype=jnp.float32)

    fwd = jax.jit(mlp_forward)
    out = jax.block_until_ready(fwd(x, params))

    ref = reference_forward(x, params)
    assert out.shape == (B, 1), out.shape
    assert jnp.allclose(out, ref, atol=2e-2, rtol=2e-2), (
        "mismatch vs reference, max abs diff = "
        f"{float(jnp.max(jnp.abs(out - ref)))}")

    print("KERNEL_OK")
</pallas_src>

<mosaic_0001>
module attributes {stable_mosaic.version = 11 : i64} {
  func.func @mlp_kernel(%arg0: i32, %arg1: memref<8x28xf32, #tpu.memory_space<vmem>>, %arg2: memref<128x28xbf16, #tpu.memory_space<vmem>>, %arg3: memref<128x1xf32, #tpu.memory_space<vmem>>, %arg4: memref<64x128xbf16, #tpu.memory_space<vmem>>, %arg5: memref<64x1xf32, #tpu.memory_space<vmem>>, %arg6: memref<32x64xbf16, #tpu.memory_space<vmem>>, %arg7: memref<32x1xf32, #tpu.memory_space<vmem>>, %arg8: memref<1x32xbf16, #tpu.memory_space<vmem>>, %arg9: memref<1x1xf32, #tpu.memory_space<smem>>, %arg10: memref<1x8xf32, #tpu.memory_space<vmem>>) attributes {dimension_semantics = [#tpu.dimension_semantics<parallel>], iteration_bounds = array<i64: 1>, scalar_prefetch = 0 : i64, scratch_operands = 0 : i64, tpu.core_type = #tpu.core_type<tc>, window_params = [{transform_indices = @transform_0, window_bounds = array<i64: 8, 28>}, {pipeline_mode = #tpu.pipeline_mode<synchronous>, transform_indices = @transform_1, window_bounds = array<i64: 128, 28>}, {pipeline_mode = #tpu.pipeline_mode<synchronous>, transform_indices = @transform_2, window_bounds = array<i64: 128, 1>}, {pipeline_mode = #tpu.pipeline_mode<synchronous>, transform_indices = @transform_3, window_bounds = array<i64: 64, 128>}, {pipeline_mode = #tpu.pipeline_mode<synchronous>, transform_indices = @transform_4, window_bounds = array<i64: 64, 1>}, {pipeline_mode = #tpu.pipeline_mode<synchronous>, transform_indices = @transform_5, window_bounds = array<i64: 32, 64>}, {pipeline_mode = #tpu.pipeline_mode<synchronous>, transform_indices = @transform_6, window_bounds = array<i64: 32, 1>}, {pipeline_mode = #tpu.pipeline_mode<synchronous>, transform_indices = @transform_7, window_bounds = array<i64: 1, 32>}, {transform_indices = @transform_8, window_bounds = array<i64: 1, 1>}, {transform_indices = @transform_9, window_bounds = array<i64: 1, 8>}]} {
    %c0 = arith.constant 0 : index
    %c0_0 = arith.constant 0 : index
    %0 = vector.load %arg1[%c0, %c0_0] : memref<8x28xf32, #tpu.memory_space<vmem>>, vector<8x28xf32>
    %1 = arith.truncf %0 : vector<8x28xf32> to vector<8x28xbf16>
    %c0_1 = arith.constant 0 : index
    %c0_2 = arith.constant 0 : index
    %2 = vector.load %arg2[%c0_1, %c0_2] : memref<128x28xbf16, #tpu.memory_space<vmem>>, vector<128x28xbf16>
    %cst = arith.constant dense<0.000000e+00> : vector<128x8xf32>
    %3 = tpu.matmul %2, %1, %cst {dimension_numbers = #tpu.dot_dimension_numbers<[1], [1], [0], [0], [0, 0, 1, 0], [], []>} : vector<128x28xbf16>, vector<8x28xbf16>, vector<128x8xf32> -> vector<128x8xf32>
    %c0_3 = arith.constant 0 : index
    %c0_4 = arith.constant 0 : index
    %4 = vector.load %arg3[%c0_3, %c0_4] : memref<128x1xf32, #tpu.memory_space<vmem>>, vector<128x1xf32>
    %5 = vector.broadcast %4 : vector<128x1xf32> to vector<128x8xf32>
    %6 = arith.addf %3, %5 : vector<128x8xf32>
    %cst_5 = arith.constant 0.000000e+00 : f32
    %7 = vector.broadcast %cst_5 : f32 to vector<128x8xf32>
    %8 = arith.subf %7, %6 : vector<128x8xf32>
    %9 = math.exp %8 : vector<128x8xf32>
    %cst_6 = arith.constant 1.000000e+00 : f32
    %10 = vector.broadcast %cst_6 : f32 to vector<128x8xf32>
    %11 = arith.addf %10, %9 : vector<128x8xf32>
    %12 = tpu.reciprocal %11 {approx = true} : vector<128x8xf32> -> vector<128x8xf32>
    %13 = arith.truncf %12 : vector<128x8xf32> to vector<128x8xbf16>
    %c0_7 = arith.constant 0 : index
    %c0_8 = arith.constant 0 : index
    %14 = vector.load %arg4[%c0_7, %c0_8] : memref<64x128xbf16, #tpu.memory_space<vmem>>, vector<64x128xbf16>
    %cst_9 = arith.constant dense<0.000000e+00> : vector<64x8xf32>
    %15 = tpu.matmul %14, %13, %cst_9 {dimension_numbers = #tpu.dot_dimension_numbers<[1], [0], [0], [1], [0, 0, 1, 1], [], []>} : vector<64x128xbf16>, vector<128x8xbf16>, vector<64x8xf32> -> vector<64x8xf32>
    %c0_10 = arith.constant 0 : index
    %c0_11 = arith.constant 0 : index
    %16 = vector.load %arg5[%c0_10, %c0_11] : memref<64x1xf32, #tpu.memory_space<vmem>>, vector<64x1xf32>
    %17 = vector.broadcast %16 : vector<64x1xf32> to vector<64x8xf32>
    %18 = arith.addf %15, %17 : vector<64x8xf32>
    %cst_12 = arith.constant 0.000000e+00 : f32
    %19 = vector.broadcast %cst_12 : f32 to vector<64x8xf32>
    %20 = arith.cmpf oge, %18, %19 : vector<64x8xf32>
    %cst_13 = arith.constant 0.00999999977 : f32
    %21 = vector.broadcast %cst_13 : f32 to vector<64x8xf32>
    %22 = arith.mulf %21, %18 : vector<64x8xf32>
    %23 = arith.select %20, %18, %22 : vector<64x8xi1>, vector<64x8xf32>
    %24 = arith.truncf %23 : vector<64x8xf32> to vector<64x8xbf16>
    %c0_14 = arith.constant 0 : index
    %c0_15 = arith.constant 0 : index
    %25 = vector.load %arg6[%c0_14, %c0_15] : memref<32x64xbf16, #tpu.memory_space<vmem>>, vector<32x64xbf16>
    %cst_16 = arith.constant dense<0.000000e+00> : vector<32x8xf32>
    %26 = tpu.matmul %25, %24, %cst_16 {dimension_numbers = #tpu.dot_dimension_numbers<[1], [0], [0], [1], [0, 0, 1, 1], [], []>} : vector<32x64xbf16>, vector<64x8xbf16>, vector<32x8xf32> -> vector<32x8xf32>
    %c0_17 = arith.constant 0 : index
    %c0_18 = arith.constant 0 : index
    %27 = vector.load %arg7[%c0_17, %c0_18] : memref<32x1xf32, #tpu.memory_space<vmem>>, vector<32x1xf32>
    %28 = vector.broadcast %27 : vector<32x1xf32> to vector<32x8xf32>
    %29 = arith.addf %26, %28 : vector<32x8xf32>
    %cst_19 = arith.constant 0.000000e+00 : f32
    %30 = vector.broadcast %cst_19 : f32 to vector<32x8xf32>
    %31 = arith.cmpf oge, %29, %30 : vector<32x8xf32>
    %cst_20 = arith.constant 0.00999999977 : f32
    %32 = vector.broadcast %cst_20 : f32 to vector<32x8xf32>
    %33 = arith.mulf %32, %29 : vector<32x8xf32>
    %34 = arith.select %31, %29, %33 : vector<32x8xi1>, vector<32x8xf32>
    %35 = arith.truncf %34 : vector<32x8xf32> to vector<32x8xbf16>
    %c0_21 = arith.constant 0 : index
    %c0_22 = arith.constant 0 : index
    %36 = vector.load %arg8[%c0_21, %c0_22] : memref<1x32xbf16, #tpu.memory_space<vmem>>, vector<1x32xbf16>
    %cst_23 = arith.constant dense<0.000000e+00> : vector<1x8xf32>
    %37 = tpu.matmul %36, %35, %cst_23 {dimension_numbers = #tpu.dot_dimension_numbers<[1], [0], [0], [1], [0, 0, 1, 1], [], []>} : vector<1x32xbf16>, vector<32x8xbf16>, vector<1x8xf32> -> vector<1x8xf32>
    %c0_24 = arith.constant 0 : index
    %c0_25 = arith.constant 0 : index
    %38 = memref.load %arg9[%c0_24, %c0_25] : memref<1x1xf32, #tpu.memory_space<smem>>
    %39 = vector.broadcast %38 : f32 to vector<1x8xf32>
    %40 = arith.addf %37, %39 : vector<1x8xf32>
    %c0_26 = arith.constant 0 : index
    %c0_27 = arith.constant 0 : index
    %41 = vector.load %arg10[%c0_26, %c0_27] : memref<1x8xf32, #tpu.memory_space<vmem>>, vector<1x8xf32>
    tpu.vector_store %arg10[%c0_26, %c0_27], %40 {strides = array<i32>} : memref<1x8xf32, #tpu.memory_space<vmem>>, vector<1x8xf32>,
    return
  }
  func.func @transform_0(%arg0: i32) -> (i32, i32) {
    %c0_i32 = arith.constant 0 : i32
    %c0_i32_0 = arith.constant 0 : i32
    return %arg0, %c0_i32 : i32, i32
  }
  func.func @transform_1(%arg0: i32) -> (i32, i32) {
    %c0_i32 = arith.constant 0 : i32
    %c0_i32_0 = arith.constant 0 : i32
    %c0_i32_1 = arith.constant 0 : i32
    return %c0_i32, %c0_i32_0 : i32, i32
  }
  func.func @transform_2(%arg0: i32) -> (i32, i32) {
    %c0_i32 = arith.constant 0 : i32
    %c0_i32_0 = arith.constant 0 : i32
    %c0_i32_1 = arith.constant 0 : i32
    return %c0_i32, %c0_i32_0 : i32, i32
  }
  func.func @transform_3(%arg0: i32) -> (i32, i32) {
    %c0_i32 = arith.constant 0 : i32
    %c0_i32_0 = arith.constant 0 : i32
    %c0_i32_1 = arith.constant 0 : i32
    return %c0_i32, %c0_i32_0 : i32, i32
  }
  func.func @transform_4(%arg0: i32) -> (i32, i32) {
    %c0_i32 = arith.constant 0 : i32
    %c0_i32_0 = arith.constant 0 : i32
    %c0_i32_1 = arith.constant 0 : i32
    return %c0_i32, %c0_i32_0 : i32, i32
  }
  func.func @transform_5(%arg0: i32) -> (i32, i32) {
    %c0_i32 = arith.constant 0 : i32
    %c0_i32_0 = arith.constant 0 : i32
    %c0_i32_1 = arith.constant 0 : i32
    return %c0_i32, %c0_i32_0 : i32, i32
  }
  func.func @transform_6(%arg0: i32) -> (i32, i32) {
    %c0_i32 = arith.constant 0 : i32
    %c0_i32_0 = arith.constant 0 : i32
    %c0_i32_1 = arith.constant 0 : i32
    return %c0_i32, %c0_i32_0 : i32, i32
  }
  func.func @transform_7(%arg0: i32) -> (i32, i32) {
    %c0_i32 = arith.constant 0 : i32
    %c0_i32_0 = arith.constant 0 : i32
    %c0_i32_1 = arith.constant 0 : i32
    return %c0_i32, %c0_i32_0 : i32, i32
  }
  func.func @transform_8(%arg0: i32) -> (i32, i32) {
    %c0_i32 = arith.constant 0 : i32
    %c0_i32_0 = arith.constant 0 : i32
    %c0_i32_1 = arith.constant 0 : i32
    return %c0_i32, %c0_i32_0 : i32, i32
  }
  func.func @transform_9(%arg0: i32) -> (i32, i32) {
    %c0_i32 = arith.constant 0 : i32
    %c0_i32_0 = arith.constant 0 : i32
    return %c0_i32, %arg0 : i32, i32
  }
}

</mosaic_0001>

<bundles_post_ra>
// kernel: mlp_forward.1
= control target key start
LH: loop header
LB: loop body
LE: loop exit
PB: predicated region body
PF: predicated region fallthrough
CT: control target
= control target key end

     0   :  { %vm189_vm0 = vcmask 228352   ;;  %v792_v2 = vmov 0   ;;  %s1019_s0 = inlined_call_operand.vmem [shape: f32[8,28], index: 0, kind: input, shape index: {}]   ;;  %s1020_s1 = inlined_call_operand.vmem [shape: bf16[128,28], index: 1, kind: input, shape index: {}]   ;;  %s1021_s2 = inlined_call_operand.vmem [shape: f32[128,1], index: 2, kind: input, shape index: {}]   ;;  %s1022_s3 = inlined_call_operand.vmem [shape: bf16[64,128], index: 3, kind: input, shape index: {}]   ;;  %s1023_s4 = inlined_call_operand.vmem [shape: f32[64,1], index: 4, kind: input, shape index: {}]   ;;  %s1024_s5 = inlined_call_operand.vmem [shape: bf16[32,64], index: 5, kind: input, shape index: {}]   ;;  %s1025_s6 = inlined_call_operand.vmem [shape: f32[32,1], index: 6, kind: input, shape index: {}]   ;;  %s1026_s7 = inlined_call_operand.vmem [shape: bf16[1,32], index: 7, kind: input, shape index: {}]   ;;  %s1027_s8 = inlined_call_operand.<no memory space> [shape: f32[1,1], index: 8, kind: input, shape index: {}]   ;;  %s1028_s9 = inlined_call_operand.hbm [shape: f32[1,8], index: 9, kind: output, shape index: {}]  }
   0x1   :  { %v67_v0 = vld [vmem:[%s1021_s2 + $0x70] sm:$0xff]  ;;  %v35_v1 = vld [vmem:[%s1019_s0] sm:$0xff]  ;;  %699 = vset.pattern.permute.xlu0 %v792_v2  ;;  %700 = vset.pattern.permute.xlu1 %v792_v2  ;;  %v68_v7 = vld [vmem:[%s1021_s2 + $0x78] sm:$0xff] }
   0x2   :  { %v36_v3 = vpack.c.bf16 %v35_v1, %v35_v1  ;;  %v65_v4 = vld [vmem:[%s1021_s2 + $0x60] sm:$0xff]  ;;  %141 = vperm.xlu0 %699, %v67_v0   ;;  %v63_v5 = vld [vmem:[%s1021_s2 + $0x50] sm:$0xff]  ;;  %701 = vset.pattern.permute.xlu2 %v792_v2 }
   0x3   :  { %131 = vperm.xlu1 %700, %v65_v4   ;;  %121 = vperm.xlu2 %701, %v63_v5  }
   0x4   :  { %v215_v6 = vsel %vm189_vm0, %v36_v3, 0 }
   0x5   :  { %224 = vmatpush.bf16.xpose.msra.mxu0 %v215_v6  ;;  %688 = vmatpush.bf16.xpose.msra.mxu3 %v215_v6 }
   0x6   :  { %15 = vsyncpa [#allocation4], 0  ;;  %v674_v8 = vld [vmem:[%s1020_s1] sm:$0xff]  ;;  %v679_v9 = vld [vmem:[%s1020_s1 + $0x28] sm:$0xff]  ;;  %vm529_vm9 = vcmask 523264   ;;  %vm572_vm14 = vcmask 261120  }
   0x7   :  { %v66_v10 = vld [vmem:[%s1021_s2 + $0x68] sm:$0xff]  ;;  %v64_v11 = vld [vmem:[%s1021_s2 + $0x58] sm:$0xff]  ;;  %v61_v12 = vld [vmem:[%s1021_s2 + $0x40] sm:$0xff]  ;;  %s793_s25 = smov [#allocation3]   ;;  %s598_s29 = sshll.u32 %s1028_s9, 4  ;;  %vm589_vm15 = vcmask 57344   ;;  %s599_s29 = int_to_ptr.hbm [resolvable:$true] %s598_s29 }
   0x8   :  { %v62_v13 = vld [vmem:[%s1021_s2 + $0x48] sm:$0xff]  ;;  %v59_v14 = vld [vmem:[%s1021_s2 + $0x30] sm:$0xff]  ;;  %v60_v15 = vld [vmem:[%s1021_s2 + $0x38] sm:$0xff]  ;;  %s596_s26 = sshll.u32 %s793_s25, 4  ;;  %s597_s26 = int_to_ptr.vmem [resolvable:$true] %s596_s26 }
   0x9   :  { %v675_v16 = vld [vmem:[%s1020_s1 + $0x8] sm:$0xff]  ;;  %v680_v17 = vld [vmem:[%s1020_s1 + $0x30] sm:$0xff]  ;;  %v57_v18 = vld [vmem:[%s1021_s2 + $0x20] sm:$0xff] }
   0xa   :  { %146 = vperm.xlu0 %699, %v68_v7   ;;  %v58_v19 = vld [vmem:[%s1021_s2 + $0x28] sm:$0xff]  ;;  %v55_v20 = vld [vmem:[%s1021_s2 + $0x10] sm:$0xff]  ;;  %v56_v21 = vld [vmem:[%s1021_s2 + $0x18] sm:$0xff] }
   0xb   :  { %136 = vperm.xlu1 %700, %v66_v10   ;;  %126 = vperm.xlu2 %701, %v64_v11   ;;  %v53_v22 = vld [vmem:[%s1021_s2] sm:$0xff]  ;;  %v54_v23 = vld [vmem:[%s1021_s2 + $0x8] sm:$0xff]  ;;  %v676_v24 = vld [vmem:[%s1020_s1 + $0x10] sm:$0xff] }
   0xc   :  { %639 = vmatmul.msk.bf16.vlgmr.msra.gmra.mxu0 %vm189_vm0, %v674_v8  ;;  %644 = vmatmul.msk.bf16.vlgmr.msra.gmra.mxu3 %vm189_vm0, %v679_v9  ;;  %v681_v25 = vld [vmem:[%s1020_s1 + $0x38] sm:$0xff]  ;;  %v368_v26 = vld [vmem:[%s1023_s4 + $0x30] sm:$0xff]  ;;  %v366_v28 = vld [vmem:[%s1023_s4 + $0x20] sm:$0xff] }
   0xd   :  { %v369_v27 = vld [vmem:[%s1023_s4 + $0x38] sm:$0xff]  ;;  %v367_v29 = vld [vmem:[%s1023_s4 + $0x28] sm:$0xff]  ;;  %v364_v30 = vld [vmem:[%s1023_s4 + $0x10] sm:$0xff] }
   0xe   :  { %v365_v31 = vld [vmem:[%s1023_s4 + $0x18] sm:$0xff]  ;;  %v362_v33 = vld [vmem:[%s1023_s4] sm:$0xff]  ;;  %v363_v34 = vld [vmem:[%s1023_s4 + $0x8] sm:$0xff] }
   0xf   :  { %v677_v32 = vld [vmem:[%s1020_s1 + $0x18] sm:$0xff]  ;;  %v497_v35 = vld [vmem:[%s1025_s6 + $0x10] sm:$0xff]  ;;  %v495_v37 = vld [vmem:[%s1025_s6] sm:$0xff] }
  0x10   :  { %v498_v36 = vld [vmem:[%s1025_s6 + $0x18] sm:$0xff]  ;;  %v496_v38 = vld [vmem:[%s1025_s6 + $0x8] sm:$0xff]  ;;  %v678_v39 = vld [vmem:[%s1020_s1 + $0x20] sm:$0xff] }
  0x12   :  { %111 = vperm.xlu0 %699, %v61_v12  }
  0x13   :  { %116 = vperm.xlu1 %700, %v62_v13   ;;  %101 = vperm.xlu2 %701, %v59_v14  }
  0x1a   :  { %106 = vperm.xlu0 %699, %v60_v15  }
  0x1b   :  { %91 = vperm.xlu1 %700, %v57_v18   ;;  %96 = vperm.xlu2 %701, %v58_v19  }
  0x1c   :  { %640 = vmatmul.msk.bf16.gmra.mxu0 %vm189_vm0, %v675_v16  ;;  %645 = vmatmul.msk.bf16.gmra.mxu3 %vm189_vm0, %v680_v17 }
  0x22   :  { %81 = vperm.xlu0 %699, %v55_v20  }
  0x23   :  { %86 = vperm.xlu1 %700, %v56_v21   ;;  %71 = vperm.xlu2 %701, %v53_v22  }
  0x2a   :  { %76 = vperm.xlu0 %699, %v54_v23  }
  0x2b   :  { %402 = vperm.xlu1 %700, %v368_v26   ;;  %407 = vperm.xlu2 %701, %v369_v27  }
  0x2c   :  { %641 = vmatmul.msk.bf16.gmra.mxu0 %vm189_vm0, %v676_v24  ;;  %646 = vmatmul.msk.bf16.gmra.mxu3 %vm189_vm0, %v681_v25 }
  0x32   :  { %392 = vperm.xlu0 %699, %v366_v28  }
  0x33   :  { %397 = vperm.xlu1 %700, %v367_v29   ;;  %382 = vperm.xlu2 %701, %v364_v30  }
  0x3a   :  { %387 = vperm.xlu0 %699, %v365_v31  }
  0x3b   :  { %372 = vperm.xlu1 %700, %v362_v33   ;;  %377 = vperm.xlu2 %701, %v363_v34  }
  0x3c   :  { %642 = vmatmul.msk.bf16.gmra.mxu0 %vm189_vm0, %v677_v32 }
  0x42   :  { %511 = vperm.xlu0 %699, %v497_v35  }
  0x43   :  { %516 = vperm.xlu1 %700, %v498_v36   ;;  %501 = vperm.xlu2 %701, %v495_v37  }
  0x4a   :  { %506 = vperm.xlu0 %699, %v496_v38  }
  0x4c   :  { %643 = vmatmul.msk.bf16.gmra.mxu0 %vm189_vm0, %v678_v39 }
  0x5d   :  { %v122_v40 = vpop.permute.xlu2 %121 }
  0x65   :  { %v127_v41 = vpop.permute.xlu2 %126 }
  0x6d   :  { %v964_v43 = vpop.permute.xlu2 %101 }
  0x74   :  { %v142_v42 = vpop.permute.xlu0 %141 }
  0x75   :  { %v968_v46 = vpop.permute.xlu2 %96  ;;  %v132_v1 = vpop.permute.xlu1 %131 }
  0x7c   :  { %v147_v44 = vpop.permute.xlu0 %146 }
  0x7d   :  { %v72_v50 = vpop.permute.xlu2 %71  ;;  %v137_v7 = vpop.permute.xlu1 %136 }
  0x84   :  { %v966_v45 = vpop.permute.xlu0 %111 }
  0x85   :  { %v117_v31 = vpop.permute.xlu1 %116 }
  0x89   :  { %v226_v47 = vpop.f32.mrf.mxu0 }
  0x8a   :  { %v227_v52 = vadd.f32 %v226_v47, %v72_v50 }
  0x8c   :  { %v970_v48 = vpop.permute.xlu0 %106  ;;  %v266_v54 = vsub.f32 0.0, %v227_v52 }
  0x8e   :  { %v282_v57 = vmul.f32 1.442695, %v266_v54 }
  0x8f   :  { %v251_v49 = vpop.f32.mrf.mxu3 }
  0x90   :  { %702 = vpow2.f32 %v282_v57  ;;  %v252_v16 = vadd.f32 %v251_v49, %v122_v40  ;;  %v92_v49 = vpop.permute.xlu1 %91 }
  0x91   :  { %v228_v51 = vpop.f32.mrf.mxu0 }
  0x92   :  { %v276_v22 = vsub.f32 0.0, %v252_v16 }
  0x94   :  { %v972_v53 = vpop.permute.xlu0 %81  ;;  %v302_v30 = vmul.f32 1.442695, %v276_v22 }
  0x96   :  { %v703_v0 = vpop.eup %702 }
  0x97   :  { %v253_v55 = vpop.f32.mrf.mxu3  ;;  %v314_v3 = vadd.f32 1.0, %v703_v0 }
  0x98   :  { %v254_v18 = vadd.f32 %v253_v55, %v127_v41 }
  0x99   :  { %v974_v56 = vpop.f32.mrf.mxu0 }
  0x9a   :  { %v277_v25 = vsub.f32 0.0, %v254_v18 }
  0x9c   :  { %v77_v58 = vpop.permute.xlu0 %76  ;;  %v304_v32 = vmul.f32 1.442695, %v277_v25 }
  0x9d   :  { %v229_v59 = vadd.f32 %v228_v51, %v77_v58 }
  0x9f   :  { %v256_v60 = vpop.f32.mrf.mxu3  ;;  %v267_v61 = vsub.f32 0.0, %v229_v59 }
  0xa0   :  { %v257_v8 = vadd.f32 %v256_v60, %v132_v1 }
  0xa1   :  { %v976_v62 = vpop.f32.mrf.mxu0  ;;  %v284_v63 = vmul.f32 1.442695, %v267_v61 }
  0xa2   :  { %v278_v17 = vsub.f32 0.0, %v257_v8 }
  0xa3   :  { %704 = vpow2.f32 %v284_v63 }
  0xa4   :  { %706 = vrcp.f32 %v314_v3  ;;  %v306_v23 = vmul.f32 1.442695, %v278_v17 }
  0xa7   :  { %v258_v2 = vpop.f32.mrf.mxu3 }
  0xa8   :  { %v259_v10 = vadd.f32 %v258_v2, %v137_v7 }
  0xa9   :  { %v978_v4 = vpop.f32.mrf.mxu0  ;;  %v705_v5 = vpop.eup %704 }
  0xaa   :  { %v315_v6 = vadd.f32 1.0, %v705_v5  ;;  %v707_v13 = vpop.eup %706  ;;  %v279_v19 = vsub.f32 0.0, %v259_v10 }
  0xac   :  { %708 = vrcp.f32 %v315_v6  ;;  %v308_v26 = vmul.f32 1.442695, %v279_v19  ;;  %v87_v6 = vpop.permute.xlu1 %86 }
  0xaf   :  { %v261_v9 = vpop.f32.mrf.mxu3 }
  0xb0   :  { %v262_v11 = vadd.f32 %v261_v9, %v142_v42 }
  0xb1   :  { %v238_v12 = vpop.f32.mrf.mxu0 }
  0xb2   :  { %v280_v14 = vsub.f32 0.0, %v262_v11  ;;  %v709_v15 = vpop.eup %708  ;;  %v239_v63 = vadd.f32 %v238_v12, %v968_v46  ;;  %v232_v46 = vadd.f32 %v974_v56, %v972_v53 }
  0xb3   :  { %v980_v21 = vpack.c.bf16 %v709_v15, %v707_v13 }
  0xb4   :  { %v310_v20 = vmul.f32 1.442695, %v280_v14  ;;  %v271_v8 = vsub.f32 0.0, %v239_v63  ;;  %v268_v18 = vsub.f32 0.0, %v232_v46  ;;  %v403_v63 = vpop.permute.xlu1 %402 }
  0xb6   :  { %710 = vpow2.f32 %v310_v20  ;;  %v292_v16 = vmul.f32 1.442695, %v271_v8  ;;  %v286_v53 = vmul.f32 1.442695, %v268_v18  ;;  %v393_v8 = vpop.permute.xlu0 %392 }
  0xb7   :  { %v263_v24 = vpop.f32.mrf.mxu3  ;;  %712 = vpow2.f32 %v306_v23 }
  0xb8   :  { %v264_v27 = vadd.f32 %v263_v24, %v147_v44  ;;  %714 = vpow2.f32 %v308_v26 }
  0xb9   :  { %v241_v28 = vpop.f32.mrf.mxu0 }
  0xba   :  { %v281_v29 = vsub.f32 0.0, %v264_v27  ;;  %v242_v58 = vadd.f32 %v241_v28, %v964_v43 }
  0xbc   :  { %v312_v33 = vmul.f32 1.442695, %v281_v29  ;;  %v711_v34 = vpop.eup %710  ;;  %v272_v3 = vsub.f32 0.0, %v242_v58  ;;  %v684_v58 = vld [vmem:[%s1022_s3 + $0x10] sm:$0xff] }
  0xbd   :  { %v713_v35 = vpop.eup %712  ;;  %v328_v36 = vadd.f32 1.0, %v711_v34 }
  0xbe   :  { %716 = vpow2.f32 %v312_v33  ;;  %v715_v38 = vpop.eup %714  ;;  %v326_v40 = vadd.f32 1.0, %v713_v35  ;;  %v294_v12 = vmul.f32 1.442695, %v272_v3  ;;  %v388_v46 = vpop.permute.xlu0 %387 }
  0xbf   :  { %718 = vpow2.f32 %v302_v30  ;;  %v327_v42 = vadd.f32 1.0, %v715_v38 }
  0xc0   :  { %720 = vpow2.f32 %v304_v32 }
  0xc1   :  { %v243_v37 = vpop.f32.mrf.mxu0  ;;  %722 = vrcp.f32 %v328_v36 }
  0xc2   :  { %v244_v54 = vadd.f32 %v243_v37, %v970_v48  ;;  %v237_v48 = vadd.f32 %v978_v4, %v92_v49 }
  0xc4   :  { %v717_v39 = vpop.eup %716  ;;  %v273_v0 = vsub.f32 0.0, %v244_v54  ;;  %v270_v14 = vsub.f32 0.0, %v237_v48  ;;  %v682_v54 = vld [vmem:[%s1022_s3] sm:$0xff] }
  0xc5   :  { %v719_v41 = vpop.eup %718  ;;  %v329_v44 = vadd.f32 1.0, %v717_v39 }
  0xc6   :  { %v721_v47 = vpop.eup %720  ;;  %v324_v50 = vadd.f32 1.0, %v719_v41  ;;  %v296_v9 = vmul.f32 1.442695, %v273_v0  ;;  %v290_v19 = vmul.f32 1.442695, %v270_v14 }
  0xc7   :  { %724 = vrcp.f32 %v329_v44  ;;  %v325_v51 = vadd.f32 1.0, %v721_v47  ;;  %v723_v57 = vpop.eup %722 }
  0xc8   :  { %726 = vrcp.f32 %v326_v40 }
  0xc9   :  { %728 = vrcp.f32 %v327_v42  ;;  %v246_v52 = vpop.f32.mrf.mxu0 }
  0xca   :  { %v247_v55 = vadd.f32 %v246_v52, %v966_v45  ;;  %730 = vrcp.f32 %v324_v50  ;;  %v234_v45 = vadd.f32 %v976_v62, %v87_v6 }
  0xcb   :  { %732 = vrcp.f32 %v325_v51 }
  0xcc   :  { %v274_v59 = vsub.f32 0.0, %v247_v55  ;;  %v269_v4 = vsub.f32 0.0, %v234_v45  ;;  %v685_v55 = vld [vmem:[%s1022_s3 + $0x18] sm:$0xff] }
  0xcd   :  { %v725_v60 = vpop.eup %724 }
  0xce   :  { %v727_v61 = vpop.eup %726  ;;  %v353_v1 = vpack.c.bf16 %v725_v60, %v723_v57  ;;  %v298_v5 = vmul.f32 1.442695, %v274_v59  ;;  %v288_v22 = vmul.f32 1.442695, %v269_v4  ;;  %v683_v57 = vld [vmem:[%s1022_s3 + $0x8] sm:$0xff] }
  0xcf   :  { %v729_v2 = vpop.eup %728 }
  0xd0   :  { %434 = vmatpush.bf16.msra.mxu1 %v353_v1  ;;  %689 = vmatpush.bf16.msra.mxu2 %v353_v1  ;;  %v731_v7 = vpop.eup %730  ;;  %v352_v11 = vpack.c.bf16 %v729_v2, %v727_v61  ;;  %734 = vpow2.f32 %v298_v5  ;;  %v408_v1 = vpop.permute.xlu2 %407 }
  0xd1   :  { %v248_v43 = vpop.f32.mrf.mxu0  ;;  %v733_v13 = vpop.eup %732  ;;  %736 = vpow2.f32 %v296_v9 }
  0xd2   :  { %v249_v10 = vadd.f32 %v248_v43, %v117_v31  ;;  %v351_v17 = vpack.c.bf16 %v733_v13, %v731_v7  ;;  %738 = vpow2.f32 %v294_v12 }
  0xd4   :  { %v275_v15 = vsub.f32 0.0, %v249_v10  ;;  %435 = vmatpush.bf16.msra.mxu1 %v352_v11  ;;  %690 = vmatpush.bf16.msra.mxu2 %v352_v11  ;;  %v398_v11 = vpop.permute.xlu1 %397 }
  0xd6   :  { %v300_v62 = vmul.f32 1.442695, %v275_v15  ;;  %v735_v20 = vpop.eup %734 }
  0xd7   :  { %v737_v56 = vpop.eup %736  ;;  %v322_v23 = vadd.f32 1.0, %v735_v20 }
  0xd8   :  { %740 = vpow2.f32 %v300_v62  ;;  %436 = vmatpush.bf16.msra.mxu1 %v351_v17  ;;  %691 = vmatpush.bf16.msra.mxu2 %v351_v17  ;;  %v739_v24 = vpop.eup %738  ;;  %v321_v26 = vadd.f32 1.0, %v737_v56  ;;  %v383_v9 = vpop.permute.xlu2 %382 }
  0xd9   :  { %742 = vpow2.f32 %v292_v16  ;;  %v320_v29 = vadd.f32 1.0, %v739_v24 }
  0xda   :  { %744 = vpow2.f32 %v290_v19 }
  0xdb   :  { %746 = vpow2.f32 %v288_v22 }
  0xdc   :  { %748 = vpow2.f32 %v286_v53  ;;  %v373_v20 = vpop.permute.xlu1 %372 }
  0xdd   :  { %750 = vrcp.f32 %v322_v23 }
  0xde   :  { %v741_v25 = vpop.eup %740 }
  0xdf   :  { %v323_v27 = vadd.f32 1.0, %v741_v25  ;;  %v743_v28 = vpop.eup %742 }
  0xe0   :  { %v745_v30 = vpop.eup %744  ;;  %v319_v31 = vadd.f32 1.0, %v743_v28  ;;  %v378_v62 = vpop.permute.xlu2 %377 }
  0xe1   :  { %752 = vrcp.f32 %v323_v27  ;;  %v747_v32 = vpop.eup %746  ;;  %v318_v34 = vadd.f32 1.0, %v745_v30 }
  0xe2   :  { %754 = vrcp.f32 %v321_v26  ;;  %v749_v33 = vpop.eup %748  ;;  %v317_v37 = vadd.f32 1.0, %v747_v32 }
  0xe3   :  { %756 = vrcp.f32 %v320_v29  ;;  %v751_v35 = vpop.eup %750  ;;  %v316_v40 = vadd.f32 1.0, %v749_v33  ;;  %v686_v33 = vld [vmem:[%s1024_s5] sm:$0xff] }
  0xe4   :  { %758 = vrcp.f32 %v319_v31 }
  0xe5   :  { %760 = vrcp.f32 %v318_v34  ;;  %v687_v34 = vld [vmem:[%s1024_s5 + $0x8] sm:$0xff] }
  0xe6   :  { %762 = vrcp.f32 %v317_v37  ;;  %v512_v37 = vpop.permute.xlu0 %511 }
  0xe7   :  { %v753_v36 = vpop.eup %752  ;;  %764 = vrcp.f32 %v316_v40 }
  0xe8   :  { %v350_v38 = vpack.c.bf16 %v753_v36, %v751_v35  ;;  %v755_v39 = vpop.eup %754 }
  0xe9   :  { %v757_v41 = vpop.eup %756 }
  0xea   :  { %437 = vmatpush.bf16.msra.mxu1 %v350_v38  ;;  %692 = vmatpush.bf16.msra.mxu2 %v350_v38  ;;  %v349_v42 = vpack.c.bf16 %v755_v39, %v757_v41  ;;  %v759_v44 = vpop.eup %758  ;;  %v502_v41 = vpop.permute.xlu2 %501 }
  0xeb   :  { %v761_v47 = vpop.eup %760 }
  0xec   :  { %v348_v49 = vpack.c.bf16 %v759_v44, %v761_v47  ;;  %v763_v50 = vpop.eup %762  ;;  %v517_v44 = vpop.permute.xlu1 %516 }
  0xed   :  { %v765_v51 = vpop.eup %764 }
  0xee   :  { %438 = vmatpush.bf16.msra.mxu1 %v349_v42  ;;  %693 = vmatpush.bf16.msra.mxu2 %v349_v42  ;;  %v347_v52 = vpack.c.bf16 %v763_v50, %v765_v51  ;;  %v507_v40 = vpop.permute.xlu0 %506 }
  0xf2   :  { %439 = vmatpush.bf16.msra.mxu1 %v348_v49  ;;  %694 = vmatpush.bf16.msra.mxu2 %v348_v49 }
  0xf6   :  { %440 = vmatpush.bf16.msra.mxu1 %v347_v52  ;;  %695 = vmatpush.bf16.msra.mxu2 %v347_v52 }
  0xfa   :  { %441 = vmatpush.bf16.msra.mxu1 %v980_v21  ;;  %696 = vmatpush.bf16.msra.mxu2 %v980_v21 }
  0xfd   :  { %442 = vmatmul.bf16.vlgmr.msra.gmra.mxu1 %v682_v54  ;;  %457 = vmatmul.bf16.vlgmr.msra.gmra.mxu2 %v685_v55 }
 0x10d   :  { %447 = vmatmul.bf16.gmra.mxu1 %v683_v57 }
 0x11d   :  { %452 = vmatmul.bf16.gmra.mxu1 %v684_v58 }
 0x17a   :  { %v443_v59 = vpop.f32.mrf.mxu1 }
 0x17b   :  { %v444_v22 = vadd.f32 %v443_v59, %v373_v20 }
 0x17d   :  { %v471_v27 = vmul.f32 0.01, %v444_v22  ;;  %vm463_vm8 = vcmp.ge.f32.partialorder %v444_v22, 0.0 }
 0x17f   :  { %v479_v31 = vsel %vm463_vm8, %v444_v22, %v471_v27 }
 0x180   :  { %v458_v60 = vpop.f32.mrf.mxu2 }
 0x181   :  { %v459_v0 = vadd.f32 %v458_v60, %v403_v63 }
 0x182   :  { %v445_v61 = vpop.f32.mrf.mxu1 }
 0x183   :  { %v477_v21 = vmul.f32 0.01, %v459_v0  ;;  %vm469_vm1 = vcmp.ge.f32.partialorder %v459_v0, 0.0  ;;  %v446_v17 = vadd.f32 %v445_v61, %v378_v62 }
 0x185   :  { %v485_v48 = vsel %vm469_vm1, %v459_v0, %v477_v21  ;;  %v472_v25 = vmul.f32 0.01, %v446_v17  ;;  %vm464_vm7 = vcmp.ge.f32.partialorder %v446_v17, 0.0  ;;  %v569_v0 = vld [vmem:[%s1026_s7] sm:$0x1] }
 0x187   :  { %v480_v30 = vsel %vm464_vm7, %v446_v17, %v472_v25 }
 0x188   :  { %v460_v2 = vpop.f32.mrf.mxu2  ;;  %v487_v32 = vpack.c.bf16 %v480_v30, %v479_v31 }
 0x189   :  { %v461_v3 = vadd.f32 %v460_v2, %v408_v1  ;;  %v571_v1 = vstv %s1027_s8 }
 0x18a   :  { %v448_v5 = vpop.f32.mrf.mxu1 }
 0x18b   :  { %v478_v6 = vmul.f32 0.01, %v461_v3  ;;  %vm470_vm2 = vcmp.ge.f32.partialorder %v461_v3, 0.0  ;;  %v449_v15 = vadd.f32 %v448_v5, %v383_v9 }
 0x18d   :  { %v486_v45 = vsel %vm470_vm2, %v461_v3, %v478_v6  ;;  %v473_v53 = vmul.f32 0.01, %v449_v15  ;;  %vm465_vm6 = vcmp.ge.f32.partialorder %v449_v15, 0.0 }
 0x18e   :  { %v490_v43 = vpack.c.bf16 %v486_v45, %v485_v48 }
 0x18f   :  { %v481_v28 = vsel %vm465_vm6, %v449_v15, %v473_v53 }
 0x190   :  { %540 = vmatpush.bf16.msrb.mxu2 %v490_v43 }
 0x192   :  { %v450_v7 = vpop.f32.mrf.mxu1 }
 0x193   :  { %v451_v12 = vadd.f32 %v450_v7, %v388_v46 }
 0x195   :  { %v474_v18 = vmul.f32 0.01, %v451_v12  ;;  %vm466_vm5 = vcmp.ge.f32.partialorder %v451_v12, 0.0 }
 0x197   :  { %v482_v26 = vsel %vm466_vm5, %v451_v12, %v474_v18 }
 0x198   :  { %v488_v29 = vpack.c.bf16 %v482_v26, %v481_v28 }
 0x19a   :  { %v453_v10 = vpop.f32.mrf.mxu1 }
 0x19b   :  { %v454_v13 = vadd.f32 %v453_v10, %v393_v8 }
 0x19d   :  { %v475_v4 = vmul.f32 0.01, %v454_v13  ;;  %vm467_vm3 = vcmp.ge.f32.partialorder %v454_v13, 0.0 }
 0x19f   :  { %v483_v56 = vsel %vm467_vm3, %v454_v13, %v475_v4 }
 0x1a2   :  { %v455_v14 = vpop.f32.mrf.mxu1 }
 0x1a3   :  { %v456_v16 = vadd.f32 %v455_v14, %v398_v11 }
 0x1a5   :  { %v476_v19 = vmul.f32 0.01, %v456_v16  ;;  %vm468_vm4 = vcmp.ge.f32.partialorder %v456_v16, 0.0 }
 0x1a7   :  { %v484_v23 = vsel %vm468_vm4, %v456_v16, %v476_v19 }
 0x1a8   :  { %v489_v24 = vpack.c.bf16 %v484_v23, %v483_v56 }
 0x1aa   :  { %541 = vmatpush.bf16.msrb.mxu2 %v489_v24 }
 0x1ae   :  { %542 = vmatpush.bf16.msrb.mxu2 %v488_v29 }
 0x1b2   :  { %543 = vmatpush.bf16.msrb.mxu2 %v487_v32 }
 0x1b5   :  { %671 = vmatmul.msk.bf16.vlgmr.msrb.gmra.mxu2 %vm529_vm9, %v686_v33 }
 0x1c5   :  { %672 = vmatmul.msk.bf16.gmra.mxu2 %vm529_vm9, %v687_v34 }
 0x238   :  { %v545_v35 = vpop.f32.mrf.mxu2 }
 0x239   :  { %v546_v49 = vadd.f32 %v545_v35, %v502_v41 }
 0x23b   :  { %v559_v55 = vmul.f32 0.01, %v546_v49  ;;  %vm555_vm13 = vcmp.ge.f32.partialorder %v546_v49, 0.0 }
 0x23d   :  { %v563_v61 = vsel %vm555_vm13, %v546_v49, %v559_v55 }
 0x240   :  { %v547_v36 = vpop.f32.mrf.mxu2 }
 0x241   :  { %v548_v42 = vadd.f32 %v547_v36, %v507_v40 }
 0x243   :  { %v560_v52 = vmul.f32 0.01, %v548_v42  ;;  %vm556_vm12 = vcmp.ge.f32.partialorder %v548_v42, 0.0 }
 0x245   :  { %v564_v60 = vsel %vm556_vm12, %v548_v42, %v560_v52 }
 0x246   :  { %v567_v63 = vpack.c.bf16 %v564_v60, %v563_v61 }
 0x248   :  { %v550_v38 = vpop.f32.mrf.mxu2 }
 0x249   :  { %v551_v39 = vadd.f32 %v550_v38, %v512_v37 }
 0x24b   :  { %v561_v50 = vmul.f32 0.01, %v551_v39  ;;  %vm557_vm10 = vcmp.ge.f32.partialorder %v551_v39, 0.0 }
 0x24d   :  { %v565_v57 = vsel %vm557_vm10, %v551_v39, %v561_v50 }
 0x250   :  { %v552_v47 = vpop.f32.mrf.mxu2 }
 0x251   :  { %v553_v51 = vadd.f32 %v552_v47, %v517_v44 }
 0x253   :  { %v562_v54 = vmul.f32 0.01, %v553_v51  ;;  %vm558_vm11 = vcmp.ge.f32.partialorder %v553_v51, 0.0 }
 0x255   :  { %v566_v58 = vsel %vm558_vm11, %v553_v51, %v562_v54 }
 0x256   :  { %v568_v59 = vpack.c.bf16 %v566_v58, %v565_v57 }
 0x258   :  { %582 = vmatpush.bf16.msrb.mxu3 %v568_v59 }
 0x25c   :  { %583 = vmatpush.bf16.msrb.mxu3 %v567_v63 }
 0x25f   :  { %673 = vmatmul.msk.bf16.vlgmr.msrb.gmra.mxu3 %vm572_vm14, %v569_v0 }
 0x2e2   :  { %v585_v2 = vpop.f32.mrf.mxu3 }
 0x2e3   :  { %v586_v21 = vadd.f32 %v585_v2, %v571_v1 }
 0x2e5   :  { %590 = vst.msk [vmem:[#allocation3] sm:$0x1] %vm589_vm15, %v586_v21 }
 0x2e6   :  { %601 = dma.vmem_to_hbm [thread:$0]  %s597_s26, 16, %s599_s29, [#allocation4]  }
 0x2ea   :  { %v587_v3 = vpop.f32.mrf.mxu3 }
 0x2eb   :  { %790 = dma.done.wait [#allocation4], 16  }
 0x2ec   :  { %791 = vsyncadd [#allocation4], 4294967280 }
 0x2ed   :  { %606 = vsyncpa [#allocation4], 1 }

</bundles_post_ra>
